<compile_context>
chip_gen: v6e
topology: v6e:2x2x1
jax: 0.10.0
libtpu: 0.0.40
codegen_flags: <defaults>
</compile_context>

<pallas_src>
import math

import jax
import jax.numpy as jnp
from jax.experimental import pallas as pl
from jax.experimental.pallas import tpu as pltpu

_EPS = 1e-12  # F.normalize default eps


def _arc_subcenter_kernel(xn_ref, w_ref, winv_ref, o_ref, acc_ref):
    # xn_ref  : (TM, D)     pre-normalized features (native dtype)
    # w_ref   : (1, D, TN)  raw weight slab for sub-center kj (native dtype)
    # winv_ref: (1, 1, TN)  1/||w|| per class row for sub-center kj (f32)
    # o_ref   : (TM, TN)    max-over-subcenters cosine
    # acc_ref : (TM, TN)    f32 running max scratch (lives across the kj axis)
    kj = pl.program_id(2)

    @pl.when(kj == 0)
    def _():
        acc_ref[...] = jnp.full_like(acc_ref, -jnp.inf)

    # MXU matmul in the input dtype with f32 accumulation: (TM, D) @ (D, TN).
    c = jnp.dot(xn_ref[...], w_ref[0], preferred_element_type=jnp.float32)
    # Post-matmul normalization scale: O(TM*TN) instead of O(C*D) pre-scaling.
    c = c * winv_ref[0]                       # (1, TN) broadcasts over rows
    acc_ref[...] = jnp.maximum(acc_ref[...], c)

    @pl.when(kj == pl.num_programs(2) - 1)
    def _():
        o_ref[...] = acc_ref[...].astype(o_ref.dtype)


def _round_up(x, m):
    return ((x + m - 1) // m) * m


def arc_margin_subcenter(features, weight, out_features, k, *,
                         tile_m=128, tile_n=512):
    """features: (B, in_features); weight: (out_features*k, in_features) as in PyTorch."""
    B, D = features.shape
    if weight.shape != (out_features * k, D):
        raise ValueError(
            f"weight shape {weight.shape} != ({out_features * k}, {D})")

    # ---- cheap wrapper-side prep (O(B*D) + O(k*C*D) layout, no per-tile work) ----
    # Normalize features once: x / max(||x||, eps) == x * rsqrt(max(||x||^2, eps^2)).
    xf = features.astype(jnp.float32)
    xn = (xf * jax.lax.rsqrt(
        jnp.maximum(jnp.sum(xf * xf, axis=-1, keepdims=True), _EPS * _EPS))
          ).astype(features.dtype)

    # PyTorch's cosine_all.view(-1, out, k) means weight row r -> (class r//k,
    # sub-center r%k).  Lay the weight out as (k, D, C) so the kernel matmul is
    # (TM, D) @ (D, TN) with a lane-dense class output; keep native dtype.
    w_ckd = weight.reshape(out_features, k, D)                  # (C, k, D)
    w_kdc = jnp.transpose(w_ckd, (1, 2, 0))                     # (k, D, C)

    # Per-row inverse L2 norm, applied as a post-matmul scale inside the kernel.
    w_sq = jnp.sum(w_ckd.astype(jnp.float32) ** 2, axis=-1)     # (C, k)
    w_inv = jax.lax.rsqrt(jnp.maximum(w_sq, _EPS * _EPS))       # (C, k)
    w_inv = jnp.transpose(w_inv, (1, 0))[:, None, :]            # (k, 1, C) f32

    # ---- tiling (pad to tile multiples; slice the padding off afterwards) ----
    tm = B if B <= tile_m else tile_m
    tn = out_features if out_features <= tile_n else tile_n
    Bp = _round_up(B, tm)
    Cp = _round_up(out_features, tn)
    if Bp != B:
        xn = jnp.pad(xn, ((0, Bp - B), (0, 0)))
    if Cp != out_features:
        w_kdc = jnp.pad(w_kdc, ((0, 0), (0, 0), (0, Cp - out_features)))
        w_inv = jnp.pad(w_inv, ((0, 0), (0, 0), (0, Cp - out_features)))

    grid = (Bp // tm, Cp // tn, k)

    out = pl.pallas_call(
        _arc_subcenter_kernel,
        out_shape=jax.ShapeDtypeStruct((Bp, Cp), features.dtype),
        grid_spec=pltpu.PrefetchScalarGridSpec(
            num_scalar_prefetch=0,
            grid=grid,
            in_specs=[
                # Features: same block across (j, kj) -> fetched once per i.
                pl.BlockSpec((tm, D), lambda i, j, kj: (i, 0)),
                # Weight slab: streams per (kj, j), auto double-buffered.
                pl.BlockSpec((1, D, tn), lambda i, j, kj: (kj, 0, j)),
                # Per-class inverse norms for this sub-center / class tile.
                pl.BlockSpec((1, 1, tn), lambda i, j, kj: (kj, 0, j)),
            ],
            out_specs=pl.BlockSpec((tm, tn), lambda i, j, kj: (i, j)),
            scratch_shapes=[pltpu.VMEM((tm, tn), jnp.float32)],
        ),
        compiler_params=pltpu.CompilerParams(
            dimension_semantics=("parallel", "parallel", "arbitrary"),
        ),
    )(xn, w_kdc, w_inv)

    return out[:B, :out_features]


def _reference(features, weight, out_features, k):
    xn = features / jnp.maximum(
        jnp.linalg.norm(features, axis=-1, keepdims=True), _EPS)
    wn = weight / jnp.maximum(
        jnp.linalg.norm(weight, axis=-1, keepdims=True), _EPS)
    cos_all = jnp.einsum("bd,cd->bc", xn, wn, precision="highest")  # (B, out*k)
    cos_all = cos_all.reshape(-1, out_features, k)
    return jnp.max(cos_all, axis=2)                                 # (B, out)


if __name__ == "__main__":
    # Small shapes consistent with the module's forward.
    batch = 2
    in_features = 32
    out_features = 16
    k = 3

    key = jax.random.PRNGKey(0)
    kx, kw = jax.random.split(key)

    # Deterministic parameter init mirroring reset_parameters():
    # uniform(-stdv, stdv), stdv = 1/sqrt(in_features)
    stdv = 1.0 / math.sqrt(in_features)
    weight = jax.random.uniform(
        kw, (out_features * k, in_features), dtype=jnp.float32,
        minval=-stdv, maxval=stdv,
    )
    features = jax.random.normal(kx, (batch, in_features), dtype=jnp.float32)

    out = arc_margin_subcenter(features, weight, out_features, k)
    out = jax.block_until_ready(out)

    ref = _reference(features, weight, out_features, k)
    assert out.shape == (batch, out_features)
    # MXU default-precision passes (and post- vs pre-matmul normalization
    # scaling) can deviate from the exact-f32 reference at the ~1e-3 level.
    assert jnp.allclose(out, ref, atol=1e-2, rtol=1e-2), "mismatch vs reference"

    print("KERNEL_OK")
</pallas_src>

<mosaic_0001>
module attributes {stable_mosaic.version = 11 : i64} {
  func.func @_arc_subcenter_kernel(%arg0: i32, %arg1: i32, %arg2: i32, %arg3: memref<2x32xf32, #tpu.memory_space<vmem>>, %arg4: memref<1x32x16xf32, #tpu.memory_space<vmem>>, %arg5: memref<1x1x16xf32, #tpu.memory_space<vmem>>, %arg6: memref<2x16xf32, #tpu.memory_space<vmem>>, %arg7: memref<2x16xf32, #tpu.memory_space<vmem>>) attributes {dimension_semantics = [#tpu.dimension_semantics<parallel>, #tpu.dimension_semantics<parallel>, #tpu.dimension_semantics<arbitrary>], iteration_bounds = array<i64: 1, 1, 3>, scalar_prefetch = 0 : i64, scratch_operands = 1 : i64, tpu.core_type = #tpu.core_type<tc>, window_params = [{transform_indices = @transform_0, window_bounds = array<i64: 2, 32>}, {transform_indices = @transform_1, window_bounds = array<i64: 1, 32, 16>}, {transform_indices = @transform_2, window_bounds = array<i64: 1, 1, 16>}, {transform_indices = @transform_3, window_bounds = array<i64: 2, 16>}]} {
    %c0_i32 = arith.constant 0 : i32
    %0 = arith.cmpi eq, %arg2, %c0_i32 : i32
    %1 = arith.extui %0 : i1 to i32
    %c0_i32_0 = arith.constant 0 : i32
    %2 = arith.cmpi ne, %1, %c0_i32_0 : i32
    scf.if %2 {
      %cst_13 = arith.constant 0xFF800000 : f32
      %17 = vector.broadcast %cst_13 : f32 to vector<2x16xf32>
      %c0_14 = arith.constant 0 : index
      %c0_15 = arith.constant 0 : index
      %18 = vector.load %arg7[%c0_14, %c0_15] : memref<2x16xf32, #tpu.memory_space<vmem>>, vector<2x16xf32>
      tpu.vector_store %arg7[%c0_14, %c0_15], %17 {strides = array<i32>} : memref<2x16xf32, #tpu.memory_space<vmem>>, vector<2x16xf32>,
    } else {
    }
    %c0 = arith.constant 0 : index
    %c0_1 = arith.constant 0 : index
    %3 = vector.load %arg3[%c0, %c0_1] : memref<2x32xf32, #tpu.memory_space<vmem>>, vector<2x32xf32>
    %c0_2 = arith.constant 0 : index
    %c0_3 = arith.constant 0 : index
    %c0_4 = arith.constant 0 : index
    %4 = vector.load %arg4[%c0_2, %c0_3, %c0_4] : memref<1x32x16xf32, #tpu.memory_space<vmem>>, vector<1x32x16xf32>
    %5 = vector.shape_cast %4 : vector<1x32x16xf32> to vector<32x16xf32>
    %cst = arith.constant dense<0.000000e+00> : vector<2x16xf32>
    %6 = tpu.matmul %3, %5, %cst {dimension_numbers = #tpu.dot_dimension_numbers<[1], [0], [0], [1], [0, 0, 1, 1], [], []>} : vector<2x32xf32>, vector<32x16xf32>, vector<2x16xf32> -> vector<2x16xf32>
    %c0_5 = arith.constant 0 : index
    %c0_6 = arith.constant 0 : index
    %c0_7 = arith.constant 0 : index
    %7 = vector.load %arg5[%c0_5, %c0_6, %c0_7] : memref<1x1x16xf32, #tpu.memory_space<vmem>>, vector<1x1x16xf32>
    %8 = vector.shape_cast %7 : vector<1x1x16xf32> to vector<1x16xf32>
    %9 = vector.broadcast %8 : vector<1x16xf32> to vector<2x16xf32>
    %10 = arith.mulf %6, %9 : vector<2x16xf32>
    %c0_8 = arith.constant 0 : index
    %c0_9 = arith.constant 0 : index
    %11 = vector.load %arg7[%c0_8, %c0_9] : memref<2x16xf32, #tpu.memory_space<vmem>>, vector<2x16xf32>
    %12 = arith.maximumf %11, %10 : vector<2x16xf32>
    %c0_10 = arith.constant 0 : index
    %c0_11 = arith.constant 0 : index
    %13 = vector.load %arg7[%c0_10, %c0_11] : memref<2x16xf32, #tpu.memory_space<vmem>>, vector<2x16xf32>
    tpu.vector_store %arg7[%c0_10, %c0_11], %12 {strides = array<i32>} : memref<2x16xf32, #tpu.memory_space<vmem>>, vector<2x16xf32>,
    %c2_i32 = arith.constant 2 : i32
    %14 = arith.cmpi eq, %arg2, %c2_i32 : i32
    %15 = arith.extui %14 : i1 to i32
    %c0_i32_12 = arith.constant 0 : i32
    %16 = arith.cmpi ne, %15, %c0_i32_12 : i32
    scf.if %16 {
      %c0_13 = arith.constant 0 : index
      %c0_14 = arith.constant 0 : index
      %17 = vector.load %arg7[%c0_13, %c0_14] : memref<2x16xf32, #tpu.memory_space<vmem>>, vector<2x16xf32>
      %c0_15 = arith.constant 0 : index
      %c0_16 = arith.constant 0 : index
      %18 = vector.load %arg6[%c0_15, %c0_16] : memref<2x16xf32, #tpu.memory_space<vmem>>, vector<2x16xf32>
      tpu.vector_store %arg6[%c0_15, %c0_16], %17 {strides = array<i32>} : memref<2x16xf32, #tpu.memory_space<vmem>>, vector<2x16xf32>,
    } else {
    }
    return
  }
  func.func @transform_0(%arg0: i32, %arg1: i32, %arg2: i32) -> (i32, i32) {
    %c0_i32 = arith.constant 0 : i32
    %c0_i32_0 = arith.constant 0 : i32
    return %arg0, %c0_i32 : i32, i32
  }
  func.func @transform_1(%arg0: i32, %arg1: i32, %arg2: i32) -> (i32, i32, i32) {
    %c0_i32 = arith.constant 0 : i32
    %c0_i32_0 = arith.constant 0 : i32
    return %arg2, %c0_i32, %arg1 : i32, i32, i32
  }
  func.func @transform_2(%arg0: i32, %arg1: i32, %arg2: i32) -> (i32, i32, i32) {
    %c0_i32 = arith.constant 0 : i32
    %c0_i32_0 = arith.constant 0 : i32
    return %arg2, %c0_i32, %arg1 : i32, i32, i32
  }
  func.func @transform_3(%arg0: i32, %arg1: i32, %arg2: i32) -> (i32, i32) {
    %c0_i32 = arith.constant 0 : i32
    return %arg0, %arg1 : i32, i32
  }
}

</mosaic_0001>

<bundles_post_ra>
// kernel: tpu_custom_call.1
= control target key start
LH: loop header
LB: loop body
LE: loop exit
PB: predicated region body
PF: predicated region fallthrough
CT: control target
= control target key end

     0   :  { %8 = vsyncpa [#allocation4], 0  ;;  %s578_s12 = smov 0   ;;  %s580_s13 = smov 0   ;;  %s638_s0 = inlined_call_operand.vmem [shape: f32[2,32], index: 0, kind: input, shape index: {}]   ;;  %s639_s1 = inlined_call_operand.vmem [shape: f32[3,32,16], index: 1, kind: input, shape index: {}]   ;;  %s640_s2 = inlined_call_operand.vmem [shape: f32[3,1,16], index: 2, kind: input, shape index: {}]   ;;  %s641_s3 = inlined_call_operand.hbm [shape: f32[2,16], index: 3, kind: output, shape index: {}]  }
   0x1   :  { %s582_s14 = smov 0  }
   0x2 LB: > { %s436_s15 = sadd.s32 4294967295, %s552_s14   ;;  %s26_s16 = sadd.s32 1, %s548_s13  ;;  %s552_s14 = sphi %s582_s14, %s14_s14   ;;  %s548_s13 = sphi %s580_s13, %s644_s13   ;;  %s544_s12 = sphi %s578_s12, %s643_s12  }
   0x3   : > { %p27_p0 = scmp.ge.s32.totalorder %s26_s16, 3  ;;  %p440_p1 = scmp.ge.s32.totalorder %s552_s14, 1 }
   0x4   : > { %p186_p2 = scmp.lt.s32.totalorder %s552_s14, 4 }
   0x5   : > { %s646_s16 = smov (%p27_p0, %s26_s16), 0 }
   0x6   : > { %p187_p3 = pnand %p440_p1, %p186_p2 }
   0x7   : > { %p222_p4 = scmp.lt.s32.totalorder (!%p187_p3), %s544_s12, 2  ;;  %p443_p5 = scmp.ne.s32.totalorder (!%p187_p3), %s544_s12, 0 }
   0x8   : > { %190 = sbr.rel (%p187_p3) target bundleno = 251 (0xfb), region = 32 }
   0xd   : > { %s223_s17 = scalar_select %p222_p4, %s544_s12, 2 }
   0xe   : > { %239 = sbr.rel (%p443_p5) target bundleno = 21 (0x15), region = 36 }
   0xf   : > { %s451_s18 = sshll.u32 %s223_s17, 5  ;;  %s235_s21 = scalar_lea.vmem %s640_s2, %s223_s17 }
  0x10   : > { %s229_s24 = scalar_lea.vmem %s639_s1, %s451_s18 }
  0x13   : > { %vm240_vm0 = vcmask 123904   ;;  %v554_v0 = vmov -inf  }
  0x14   : > { %241 = vst.msk [vmem:[#allocation2] sm:$0x3] %vm240_vm0, %v554_v0 }
  0x15 PF: > { %v246_v1 = vld [vmem:[%s229_s24 + $0x18] sm:$0xff]  ;;  %v555_v2 = vmov 0.0   ;;  %v245_v3 = vld [vmem:[%s229_s24 + $0x10] sm:$0xff]  ;;  %vm556_vm1 = vmmov 0   ;;  %v244_v4 = vld [vmem:[%s229_s24 + $0x8] sm:$0xff]  ;;  %vm247_vm2 = vcmask 261120  }
  0x16   : > { %457 = vmatprep.subr.mxu0 %v555_v2  ;;  %465 = vmatprep.mubr.msk.f32.mxu0 %vm556_vm1, %v555_v2  ;;  %v243_v5 = vld [vmem:[%s229_s24] sm:$0xff]  ;;  %vm331_vm3 = vcmask 123904   ;;  %p446_p6 = scmp.ne.s32.totalorder %s544_s12, 2 }
  0x17   : > { %458 = vmatpush3.msra.mxu0 %v246_v1  ;;  %v242_v6 = vld [vmem:[%s638_s0] sm:$0x3] }
  0x18   : > { %459 = vmatprep.subr.mxu0 %v555_v2  ;;  %v445_v7 = vld [vmem:[%s235_s21] ss:$0 sm:$0xff] }
  0x19   : > { %460 = vmatpush3.msra.mxu0 %v245_v3 }
  0x1a   : > { %461 = vmatprep.subr.mxu0 %v555_v2 }
  0x1b   : > { %462 = vmatpush3.msra.mxu0 %v244_v4  ;;  %v329_v9 = vld [vmem:[#allocation2] sm:$0x3] }
  0x1c   : > { %463 = vmatprep.subr.mxu0 %v555_v2 }
  0x1d   : > { %464 = vmatpush3.msra.mxu0 %v243_v5 }
  0x1e   : > { %466 = vmatmul.mubr.msk.f32.vlgmr.msra.gmra.mxu0 %vm247_vm2, %v242_v6 }
  0xde   : > { %v317_v8 = vpop.f32.mrf.mxu0 }
  0xdf   : > { %v328_v10 = vmul.f32 %v445_v7, %v317_v8  ;;  %336 = sbr.rel (%p446_p6) target bundleno = 236 (0xec), region = 40 }
  0xe0   : > { %v467_v11 = vpop.f32.mrf.mxu0 }
  0xe1   : > { %v330_v12 = vmax.f32 %v329_v9, %v328_v10 }
  0xe3   : > { %332 = vst.msk [vmem:[#allocation2] sm:$0x3] %vm331_vm3, %v330_v12 }
  0xea   : > { %v337_v13 = vld [vmem:[#allocation2] sm:$0x3] }
  0xeb   : > { %338 = vst.msk [vmem:[#allocation3] sm:$0x3] %vm331_vm3, %v337_v13 }
  0xec PF: > { %p614_p7 = scmp.eq.s32.totalorder %s436_s15, 2  ;;  %s557_s28 = smov [#allocation3]  }
  0xed   : > { %s349_s29 = sshll.u32 %s557_s28, 4  ;;  %s350_s29 = int_to_ptr.vmem [resolvable:$true] %s349_s29 }
  0xee   : > { %s502_s30 = scalar_lea.vmem %s350_s29, 32  ;;  %p509_p11 = scmp.lt.s32.totalorder %s350_s29, %s350_s29 }
  0xef   : > { %p503_p8 = scmp.ne.s32.totalorder %s350_s29, %s502_s30  ;;  %p510_p12 = scmp.lt.s32.totalorder %s502_s30, %s502_s30 }
  0xf1   : > { %p504_p9 = pnand %p503_p8, %p614_p7  ;;  %p511_p13 = por %p510_p12, %p509_p11 }
  0xf3   : > { %p505_p10 = pneg %p504_p9 }
  0xf5   : > { %p512_p0 = pnand %p511_p13, %p505_p10 }
  0xf7   : > { %515 = shalt.err (!%p512_p0)
}
  0xf8   : > { %469 = dma.vmem_to_hbm [thread:$0]  (%p614_p7), %s350_s29, 32, %s641_s3, [#allocation4]  }
  0xf9   : > { %539 = dma.done.wait (%p614_p7), [#allocation4], 32  }
  0xfa   : > { %541 = vsyncadd (%p614_p7), [#allocation4], 4294967264 }
  0xfb PF: > { %s14_s14 = sadd.s32 1, %s552_s14   ;;  %s643_s12 = smov %s548_s13 }
  0xfc   : > { %p11_p1 = scmp.ge.s32.totalorder %s14_s14, 5   ;;  %s644_s13 = smov %s646_s16 }
  0xfe   :  { %13 = sbr.rel (!%p11_p1) target bundleno = 2 (0x2), region = 74 }
 0x103   :  { %362 = vsyncpa [#allocation4], 1 }
 0x104   :  { %364 = vsyncpa [#allocation4 + $0x1], 1 }

</bundles_post_ra>
